<compile_context>
chip_gen: v7x
topology: tpu7x:2x2x1
jax: 0.10.0
libtpu: 0.0.40
codegen_flags: <defaults>
</compile_context>

<pallas_src>
import functools

import numpy as np
import jax
import jax.numpy as jnp
from jax.experimental import pallas as pl
from jax.experimental.pallas import tpu as pltpu


# ----------------------------- Pallas kernels ------------------------------

def gemm_stats_kernel(a_ref, b_ref, y_ref, psum_ref, pssq_ref):
    """One M-tile of conv-as-GEMM + per-tile partial BN statistics.

    Partial sum / sum-of-squares go to per-tile output blocks (no resident
    accumulator), so all grid steps write disjoint blocks and the grid axis is
    'parallel'.  The axis-0 reductions are XLU/VPU filler under the MXU dot.
    """
    y = jnp.dot(a_ref[...], b_ref[...], preferred_element_type=jnp.float32)
    y_ref[...] = y
    s = jnp.sum(y, axis=0, keepdims=True)         # (1, C)
    q = jnp.sum(y * y, axis=0, keepdims=True)     # (1, C)
    # Broadcast to the full (8, C) stats block (wrapper reads sublane 0).
    psum_ref[...] = jnp.broadcast_to(s, psum_ref.shape)
    pssq_ref[...] = jnp.broadcast_to(q, pssq_ref.shape)


def add_bn_relu_kernel(y2_ref, scale_ref, shift_ref, xs_ref, out_ref):
    """Identity shortcut: relu(xs + relu(bn2(conv2))) — pure elementwise."""
    main = jnp.maximum(y2_ref[...] * scale_ref[...] + shift_ref[...], 0.0)
    out_ref[...] = jnp.maximum(xs_ref[...] + main, 0.0)


def final_proj_kernel(y2_ref, scale_ref, shift_ref, xs_ref, w3_ref, b3_ref, out_ref):
    """Projection shortcut: relu((xs @ w3 + b3) + relu(bn2(conv2)))."""
    main = jnp.maximum(y2_ref[...] * scale_ref[...] + shift_ref[...], 0.0)
    sc = jnp.dot(xs_ref[...], w3_ref[...],
                 preferred_element_type=jnp.float32) + b3_ref[...]
    out_ref[...] = jnp.maximum(sc + main, 0.0)


# ----------------------------- helpers / wrappers ---------------------------

def _round_up(x, m):
    return ((x + m - 1) // m) * m


def _pad_rows(a, rows):
    pad = rows - a.shape[0]
    return a if pad == 0 else jnp.pad(a, ((0, pad), (0, 0)))


def _choose_tile_m(M, K, C, in_itemsize, budget_bytes=12 * 1024 * 1024):
    """Largest M-tile (multiple of 128, <=1024) whose double-buffered working
    set fits comfortably inside the default scoped VMEM of every TPU gen
    (v5e 16MiB, v6e 32MiB, v7x 32MiB scoped / 64MiB physical)."""
    tm = 128
    for cand in (1024, 512, 256, 128):
        need = 2 * (cand * K * in_itemsize       # A tile (double buffered)
                    + K * C * in_itemsize        # B tile
                    + cand * C * 4               # f32 output tile
                    + 2 * 8 * C * 4)             # partial-stats tiles
        if need <= budget_bytes:
            tm = cand
            break
    # Never make the tile bigger than the (row-padded) problem itself.
    return min(tm, _round_up(M, 128))


def conv_gemm_stats(patches, w, compute_dtype):
    """y = patches @ w  (f32 accumulate) + per-channel sum / sum-of-squares.

    Rows are zero-padded to a tile multiple; zero A-rows produce exactly zero
    outputs (no bias), so the stats stay correct when divided by the real M.
    """
    M, K = patches.shape
    C = w.shape[1]
    itemsize = jnp.dtype(compute_dtype).itemsize
    tm = _choose_tile_m(M, K, C, itemsize)
    Mpad = _round_up(M, tm)
    grid_m = Mpad // tm

    a = _pad_rows(patches.astype(compute_dtype), Mpad)
    b = w.astype(compute_dtype)

    y, psum, pssq = pl.pallas_call(
        gemm_stats_kernel,
        out_shape=(jax.ShapeDtypeStruct((Mpad, C), jnp.float32),
                   jax.ShapeDtypeStruct((8 * grid_m, C), jnp.float32),
                   jax.ShapeDtypeStruct((8 * grid_m, C), jnp.float32)),
        grid_spec=pltpu.PrefetchScalarGridSpec(
            num_scalar_prefetch=0, grid=(grid_m,),
            in_specs=[pl.BlockSpec((tm, K), lambda i: (i, 0)),
                      pl.BlockSpec((K, C), lambda i: (0, 0))],
            out_specs=(pl.BlockSpec((tm, C), lambda i: (i, 0)),
                       pl.BlockSpec((8, C), lambda i: (i, 0)),
                       pl.BlockSpec((8, C), lambda i: (i, 0)))),
        compiler_params=pltpu.CompilerParams(
            dimension_semantics=("parallel",),
            vmem_limit_bytes=32 * 1024 * 1024),
    )(a, b)

    s = psum.reshape(grid_m, 8, C)[:, 0, :].sum(axis=0)   # (C,)
    q = pssq.reshape(grid_m, 8, C)[:, 0, :].sum(axis=0)   # (C,)
    return y, s, q


def _residual_elementwise(y2v, scale_v, shift_v, xsv):
    """Tiled launcher for the identity-shortcut epilogue on a (R, L) view."""
    R, L = y2v.shape
    tr = min(512, _round_up(R, 8))
    Rp = _round_up(R, tr)
    y2p = _pad_rows(y2v, Rp)
    xsp = _pad_rows(xsv, Rp)
    out = pl.pallas_call(
        add_bn_relu_kernel,
        out_shape=jax.ShapeDtypeStruct((Rp, L), jnp.float32),
        grid_spec=pltpu.PrefetchScalarGridSpec(
            num_scalar_prefetch=0, grid=(Rp // tr,),
            in_specs=[pl.BlockSpec((tr, L), lambda i: (i, 0)),
                      pl.BlockSpec((1, L), lambda i: (0, 0)),
                      pl.BlockSpec((1, L), lambda i: (0, 0)),
                      pl.BlockSpec((tr, L), lambda i: (i, 0))],
            out_specs=pl.BlockSpec((tr, L), lambda i: (i, 0))),
        compiler_params=pltpu.CompilerParams(
            dimension_semantics=("parallel",),
            vmem_limit_bytes=32 * 1024 * 1024),
    )(y2p, scale_v, shift_v, xsp)
    return out[:R]


def fused_residual_identity(y2, scale, shift, xs):
    """same_shape=True: no shortcut GEMM; lane-dense (128-wide) view if C<128."""
    M, C = y2.shape
    if C < 128 and 128 % C == 0:
        rep = 128 // C
        Mp = _round_up(M, rep)
        y2v = _pad_rows(y2, Mp).reshape(-1, 128)
        xsv = _pad_rows(xs, Mp).reshape(-1, 128)
        sv = jnp.tile(scale, (1, rep))
        tv = jnp.tile(shift, (1, rep))
        out = _residual_elementwise(y2v, sv, tv, xsv)
        return out.reshape(Mp, C)[:M]
    out = _residual_elementwise(y2, scale, shift, xs)
    return out[:M]


def fused_residual_projection(y2, scale, shift, xs, w3, b3, compute_dtype):
    """same_shape=False: 1x1-conv shortcut GEMM fused with the BN2/ReLU/add epilogue."""
    M, C = y2.shape
    Kx = xs.shape[1]
    itemsize = jnp.dtype(compute_dtype).itemsize
    tm = _choose_tile_m(M, Kx, C, itemsize)
    Mp = _round_up(M, tm)
    y2p = _pad_rows(y2, Mp)
    xsp = _pad_rows(xs.astype(compute_dtype), Mp)
    w3c = w3.astype(compute_dtype)
    out = pl.pallas_call(
        final_proj_kernel,
        out_shape=jax.ShapeDtypeStruct((Mp, C), jnp.float32),
        grid_spec=pltpu.PrefetchScalarGridSpec(
            num_scalar_prefetch=0, grid=(Mp // tm,),
            in_specs=[pl.BlockSpec((tm, C), lambda i: (i, 0)),
                      pl.BlockSpec((1, C), lambda i: (0, 0)),
                      pl.BlockSpec((1, C), lambda i: (0, 0)),
                      pl.BlockSpec((tm, Kx), lambda i: (i, 0)),
                      pl.BlockSpec((Kx, C), lambda i: (0, 0)),
                      pl.BlockSpec((1, C), lambda i: (0, 0))],
            out_specs=pl.BlockSpec((tm, C), lambda i: (i, 0))),
        compiler_params=pltpu.CompilerParams(
            dimension_semantics=("parallel",),
            vmem_limit_bytes=32 * 1024 * 1024),
    )(y2p, scale, shift, xsp, w3c, b3)
    return out[:M]


# ------------------------------- glue (JAX) ---------------------------------

def im2col(x_nhwc, ksize, stride, pad):
    """Patch extraction (data layout only); K ordering is (kh, kw, C), matching
    the HWIO weight reshape used below."""
    N, H, W, C = x_nhwc.shape
    xp = jnp.pad(x_nhwc, ((0, 0), (pad, pad), (pad, pad), (0, 0)))
    Ho = (H + 2 * pad - ksize) // stride + 1
    Wo = (W + 2 * pad - ksize) // stride + 1
    cols = []
    for kh in range(ksize):
        for kw in range(ksize):
            cols.append(xp[:, kh:kh + stride * Ho:stride, kw:kw + stride * Wo:stride, :])
    patches = jnp.stack(cols, axis=3)                      # (N, Ho, Wo, k*k, C)
    return patches.reshape(N * Ho * Wo, ksize * ksize * C), (N, Ho, Wo)


def bn_affine(s, q, count, gamma, beta, eps=1e-5):
    """Training-mode BN affine from sum / sum-of-squares over the real M rows."""
    # NOTE: ssq/M - mean^2 can cancel for very large M; acceptable at f32 here.
    mean = s / count
    var = jnp.maximum(q / count - mean * mean, 0.0)        # biased variance
    scale = gamma.reshape(1, -1) / jnp.sqrt(var.reshape(1, -1) + eps)
    shift = beta.reshape(1, -1) - mean.reshape(1, -1) * scale
    return scale, shift


@functools.partial(jax.jit, static_argnames=("same_shape", "compute_dtype"))
def residual_block_forward(x_nchw, params, same_shape=True,
                           compute_dtype=jnp.bfloat16):
    stride = 1 if same_shape else 2
    x = jnp.transpose(x_nchw, (0, 2, 3, 1)).astype(jnp.float32)   # NCHW -> NHWC
    N, H, W, Cin = x.shape
    Cout = params['w1'].shape[0]

    # conv1: 3x3, stride, pad=1, no bias -> GEMM + fused batch statistics.
    p1, (_, Ho, Wo) = im2col(x, 3, stride, 1)
    M = N * Ho * Wo
    w1m = jnp.transpose(params['w1'], (2, 3, 1, 0)).reshape(-1, Cout)
    y1, s1, q1 = conv_gemm_stats(p1, w1m, compute_dtype)
    scale1, shift1 = bn_affine(s1, q1, M, params['g1'], params['b1'])

    # bn1 + relu fused into the conv2 patch extraction producer (no separate
    # pallas pass / no standalone t1 HBM round-trip under jit fusion).
    t1 = jnp.maximum(y1[:M] * scale1 + shift1, 0.0).reshape(N, Ho, Wo, Cout)

    # conv2: 3x3, stride 1, pad=1, no bias.
    p2, _ = im2col(t1, 3, 1, 1)
    w2m = jnp.transpose(params['w2'], (2, 3, 1, 0)).reshape(-1, Cout)
    y2, s2, q2 = conv_gemm_stats(p2, w2m, compute_dtype)
    scale2, shift2 = bn_affine(s2, q2, M, params['g2'], params['b2'])
    y2 = y2[:M]

    # shortcut + bn2 + relu + residual add + final relu.
    if same_shape:
        xs = x.reshape(M, Cin)                              # identity (Cin == Cout)
        out = fused_residual_identity(y2, scale2, shift2, xs)
    else:
        xs = x[:, ::stride, ::stride, :].reshape(M, Cin)    # 1x1 conv, stride 2
        w3m = params['w3'].reshape(Cout, Cin).T
        b3 = params['b3'].reshape(1, Cout)
        out = fused_residual_projection(y2, scale2, shift2, xs, w3m, b3,
                                        compute_dtype)

    out = out.reshape(N, Ho, Wo, Cout)
    return jnp.transpose(out, (0, 3, 1, 2))                 # NHWC -> NCHW


# ------------------------- pure-JAX reference check --------------------------

def ref_forward(x_nchw, p, same_shape=True):
    s = 1 if same_shape else 2

    def conv(x, w, stride, pad):
        return jax.lax.conv_general_dilated(
            x, w, (stride, stride), [(pad, pad), (pad, pad)],
            dimension_numbers=('NCHW', 'OIHW', 'NCHW'))

    def bn(y, gamma, beta):
        mean = jnp.mean(y, axis=(0, 2, 3), keepdims=True)
        var = jnp.var(y, axis=(0, 2, 3), keepdims=True)
        return ((y - mean) / jnp.sqrt(var + 1e-5)) * gamma.reshape(1, -1, 1, 1) \
               + beta.reshape(1, -1, 1, 1)

    out = conv(x_nchw, p['w1'], s, 1)
    out = jax.nn.relu(bn(out, p['g1'], p['b1']))
    out = conv(out, p['w2'], 1, 1)
    out = jax.nn.relu(bn(out, p['g2'], p['b2']))
    x = x_nchw
    if not same_shape:
        x = conv(x, p['w3'], s, 0) + p['b3'].reshape(1, -1, 1, 1)
    return jax.nn.relu(x + out)


# ----------------------------------- main ------------------------------------

if __name__ == "__main__":
    key = jax.random.PRNGKey(0)
    ks = jax.random.split(key, 12)

    # Case 1: same_shape=True (identity shortcut, stride 1) — f32 exactness.
    N, Cin, H, W = 2, 8, 16, 16
    Cout = 8
    x = jax.random.normal(ks[0], (N, Cin, H, W), jnp.float32)
    params = {
        'w1': 0.1 * jax.random.normal(ks[1], (Cout, Cin, 3, 3), jnp.float32),
        'g1': 1.0 + 0.1 * jax.random.normal(ks[2], (Cout,), jnp.float32),
        'b1': 0.1 * jax.random.normal(ks[3], (Cout,), jnp.float32),
        'w2': 0.1 * jax.random.normal(ks[4], (Cout, Cout, 3, 3), jnp.float32),
        'g2': 1.0 + 0.1 * jax.random.normal(ks[5], (Cout,), jnp.float32),
        'b2': 0.1 * jax.random.normal(ks[6], (Cout,), jnp.float32),
    }
    out = residual_block_forward(x, params, same_shape=True,
                                 compute_dtype=jnp.float32)
    jax.block_until_ready(out)
    np.testing.assert_allclose(np.asarray(out),
                               np.asarray(ref_forward(x, params, True)),
                               rtol=1e-3, atol=1e-3)

    # Case 2: same_shape=False (stride 2 + 1x1 projection shortcut) — f32.
    Cin2, Cout2 = 4, 8
    x2 = jax.random.normal(ks[7], (N, Cin2, H, W), jnp.float32)
    params2 = {
        'w1': 0.1 * jax.random.normal(ks[8], (Cout2, Cin2, 3, 3), jnp.float32),
        'g1': jnp.ones((Cout2,), jnp.float32),
        'b1': jnp.zeros((Cout2,), jnp.float32),
        'w2': 0.1 * jax.random.normal(ks[9], (Cout2, Cout2, 3, 3), jnp.float32),
        'g2': jnp.ones((Cout2,), jnp.float32),
        'b2': jnp.zeros((Cout2,), jnp.float32),
        'w3': 0.1 * jax.random.normal(ks[10], (Cout2, Cin2, 1, 1), jnp.float32),
        'b3': 0.1 * jax.random.normal(ks[11], (Cout2,), jnp.float32),
    }
    out2 = residual_block_forward(x2, params2, same_shape=False,
                                  compute_dtype=jnp.float32)
    jax.block_until_ready(out2)
    np.testing.assert_allclose(np.asarray(out2),
                               np.asarray(ref_forward(x2, params2, False)),
                               rtol=1e-3, atol=1e-3)

    # Case 3: default bf16 MXU fast path (v6e/v7x) — looser tolerance is
    # inherent to bf16 operands; accumulation stays f32.
    out_bf16 = residual_block_forward(x, params, same_shape=True)
    jax.block_until_ready(out_bf16)
    np.testing.assert_allclose(np.asarray(out_bf16),
                               np.asarray(ref_forward(x, params, True)),
                               rtol=5e-2, atol=5e-2)

    print("KERNEL_OK")
</pallas_src>

<mosaic_0001>
module attributes {stable_mosaic.version = 11 : i64} {
  func.func @gemm_stats_kernel(%arg0: i32, %arg1: memref<512x72xf32, #tpu.memory_space<vmem>>, %arg2: memref<72x8xf32, #tpu.memory_space<vmem>>, %arg3: memref<512x8xf32, #tpu.memory_space<vmem>>, %arg4: memref<8x8xf32, #tpu.memory_space<vmem>>, %arg5: memref<8x8xf32, #tpu.memory_space<vmem>>) attributes {dimension_semantics = [#tpu.dimension_semantics<parallel>], iteration_bounds = array<i64: 1>, scalar_prefetch = 0 : i64, scratch_operands = 0 : i64, tpu.core_type = #tpu.core_type<tc>, window_params = [{transform_indices = @transform_0, window_bounds = array<i64: 512, 72>}, {pipeline_mode = #tpu.pipeline_mode<synchronous>, transform_indices = @transform_1, window_bounds = array<i64: 72, 8>}, {transform_indices = @transform_2, window_bounds = array<i64: 512, 8>}, {transform_indices = @transform_3, window_bounds = array<i64: 8, 8>}, {transform_indices = @transform_4, window_bounds = array<i64: 8, 8>}]} {
    %c0 = arith.constant 0 : index
    %c0_0 = arith.constant 0 : index
    %0 = vector.load %arg1[%c0, %c0_0] : memref<512x72xf32, #tpu.memory_space<vmem>>, vector<512x72xf32>
    %c0_1 = arith.constant 0 : index
    %c0_2 = arith.constant 0 : index
    %1 = vector.load %arg2[%c0_1, %c0_2] : memref<72x8xf32, #tpu.memory_space<vmem>>, vector<72x8xf32>
    %cst = arith.constant dense<0.000000e+00> : vector<512x8xf32>
    %2 = tpu.matmul %0, %1, %cst {dimension_numbers = #tpu.dot_dimension_numbers<[1], [0], [0], [1], [0, 0, 1, 1], [], []>} : vector<512x72xf32>, vector<72x8xf32>, vector<512x8xf32> -> vector<512x8xf32>
    %c0_3 = arith.constant 0 : index
    %c0_4 = arith.constant 0 : index
    %3 = vector.load %arg3[%c0_3, %c0_4] : memref<512x8xf32, #tpu.memory_space<vmem>>, vector<512x8xf32>
    tpu.vector_store %arg3[%c0_3, %c0_4], %2 {strides = array<i32>} : memref<512x8xf32, #tpu.memory_space<vmem>>, vector<512x8xf32>,
    %cst_5 = arith.constant dense<0.000000e+00> : vector<8xf32>
    %4 = vector.multi_reduction <add>, %2, %cst_5 [0] : vector<512x8xf32> to vector<8xf32>
    %5 = vector.shape_cast %4 : vector<8xf32> to vector<1x8xf32>
    %6 = arith.mulf %2, %2 : vector<512x8xf32>
    %cst_6 = arith.constant dense<0.000000e+00> : vector<8xf32>
    %7 = vector.multi_reduction <add>, %6, %cst_6 [0] : vector<512x8xf32> to vector<8xf32>
    %8 = vector.shape_cast %7 : vector<8xf32> to vector<1x8xf32>
    %9 = vector.shape_cast %5 : vector<1x8xf32> to vector<1x8xf32>
    %10 = vector.broadcast %9 : vector<1x8xf32> to vector<8x8xf32>
    %c0_7 = arith.constant 0 : index
    %c0_8 = arith.constant 0 : index
    %11 = vector.load %arg4[%c0_7, %c0_8] : memref<8x8xf32, #tpu.memory_space<vmem>>, vector<8x8xf32>
    tpu.vector_store %arg4[%c0_7, %c0_8], %10 {strides = array<i32>} : memref<8x8xf32, #tpu.memory_space<vmem>>, vector<8x8xf32>,
    %12 = vector.shape_cast %8 : vector<1x8xf32> to vector<1x8xf32>
    %13 = vector.broadcast %12 : vector<1x8xf32> to vector<8x8xf32>
    %c0_9 = arith.constant 0 : index
    %c0_10 = arith.constant 0 : index
    %14 = vector.load %arg5[%c0_9, %c0_10] : memref<8x8xf32, #tpu.memory_space<vmem>>, vector<8x8xf32>
    tpu.vector_store %arg5[%c0_9, %c0_10], %13 {strides = array<i32>} : memref<8x8xf32, #tpu.memory_space<vmem>>, vector<8x8xf32>,
    return
  }
  func.func @transform_0(%arg0: i32) -> (i32, i32) {
    %c0_i32 = arith.constant 0 : i32
    %c0_i32_0 = arith.constant 0 : i32
    return %arg0, %c0_i32 : i32, i32
  }
  func.func @transform_1(%arg0: i32) -> (i32, i32) {
    %c0_i32 = arith.constant 0 : i32
    %c0_i32_0 = arith.constant 0 : i32
    %c0_i32_1 = arith.constant 0 : i32
    return %c0_i32, %c0_i32_0 : i32, i32
  }
  func.func @transform_2(%arg0: i32) -> (i32, i32) {
    %c0_i32 = arith.constant 0 : i32
    %c0_i32_0 = arith.constant 0 : i32
    return %arg0, %c0_i32 : i32, i32
  }
  func.func @transform_3(%arg0: i32) -> (i32, i32) {
    %c0_i32 = arith.constant 0 : i32
    %c0_i32_0 = arith.constant 0 : i32
    return %arg0, %c0_i32 : i32, i32
  }
  func.func @transform_4(%arg0: i32) -> (i32, i32) {
    %c0_i32 = arith.constant 0 : i32
    %c0_i32_0 = arith.constant 0 : i32
    return %arg0, %c0_i32 : i32, i32
  }
}

module attributes {stable_mosaic.version = 11 : i64} {
  func.func @add_bn_relu_kernel(%arg0: i32, %arg1: memref<32x128xf32, #tpu.memory_space<vmem>>, %arg2: memref<1x128xf32, #tpu.memory_space<vmem>>, %arg3: memref<1x128xf32, #tpu.memory_space<vmem>>, %arg4: memref<32x128xf32, #tpu.memory_space<vmem>>, %arg5: memref<32x128xf32, #tpu.memory_space<vmem>>) attributes {dimension_semantics = [#tpu.dimension_semantics<parallel>], iteration_bounds = array<i64: 1>, scalar_prefetch = 0 : i64, scratch_operands = 0 : i64, tpu.core_type = #tpu.core_type<tc>, window_params = [{transform_indices = @transform_0, window_bounds = array<i64: 32, 128>}, {pipeline_mode = #tpu.pipeline_mode<synchronous>, transform_indices = @transform_1, window_bounds = array<i64: 1, 128>}, {pipeline_mode = #tpu.pipeline_mode<synchronous>, transform_indices = @transform_2, window_bounds = array<i64: 1, 128>}, {transform_indices = @transform_3, window_bounds = array<i64: 32, 128>}, {transform_indices = @transform_4, window_bounds = array<i64: 32, 128>}]} {
    %c0 = arith.constant 0 : index
    %c0_0 = arith.constant 0 : index
    %0 = vector.load %arg1[%c0, %c0_0] : memref<32x128xf32, #tpu.memory_space<vmem>>, vector<32x128xf32>
    %c0_1 = arith.constant 0 : index
    %c0_2 = arith.constant 0 : index
    %1 = vector.load %arg2[%c0_1, %c0_2] : memref<1x128xf32, #tpu.memory_space<vmem>>, vector<1x128xf32>
    %2 = vector.broadcast %1 : vector<1x128xf32> to vector<32x128xf32>
    %3 = arith.mulf %0, %2 : vector<32x128xf32>
    %c0_3 = arith.constant 0 : index
    %c0_4 = arith.constant 0 : index
    %4 = vector.load %arg3[%c0_3, %c0_4] : memref<1x128xf32, #tpu.memory_space<vmem>>, vector<1x128xf32>
    %5 = vector.broadcast %4 : vector<1x128xf32> to vector<32x128xf32>
    %6 = arith.addf %3, %5 : vector<32x128xf32>
    %cst = arith.constant 0.000000e+00 : f32
    %7 = vector.broadcast %cst : f32 to vector<32x128xf32>
    %8 = arith.maximumf %6, %7 : vector<32x128xf32>
    %c0_5 = arith.constant 0 : index
    %c0_6 = arith.constant 0 : index
    %9 = vector.load %arg4[%c0_5, %c0_6] : memref<32x128xf32, #tpu.memory_space<vmem>>, vector<32x128xf32>
    %10 = arith.addf %9, %8 : vector<32x128xf32>
    %cst_7 = arith.constant 0.000000e+00 : f32
    %11 = vector.broadcast %cst_7 : f32 to vector<32x128xf32>
    %12 = arith.maximumf %10, %11 : vector<32x128xf32>
    %c0_8 = arith.constant 0 : index
    %c0_9 = arith.constant 0 : index
    %13 = vector.load %arg5[%c0_8, %c0_9] : memref<32x128xf32, #tpu.memory_space<vmem>>, vector<32x128xf32>
    tpu.vector_store %arg5[%c0_8, %c0_9], %12 {strides = array<i32>} : memref<32x128xf32, #tpu.memory_space<vmem>>, vector<32x128xf32>,
    return
  }
  func.func @transform_0(%arg0: i32) -> (i32, i32) {
    %c0_i32 = arith.constant 0 : i32
    %c0_i32_0 = arith.constant 0 : i32
    return %arg0, %c0_i32 : i32, i32
  }
  func.func @transform_1(%arg0: i32) -> (i32, i32) {
    %c0_i32 = arith.constant 0 : i32
    %c0_i32_0 = arith.constant 0 : i32
    %c0_i32_1 = arith.constant 0 : i32
    return %c0_i32, %c0_i32_0 : i32, i32
  }
  func.func @transform_2(%arg0: i32) -> (i32, i32) {
    %c0_i32 = arith.constant 0 : i32
    %c0_i32_0 = arith.constant 0 : i32
    %c0_i32_1 = arith.constant 0 : i32
    return %c0_i32, %c0_i32_0 : i32, i32
  }
  func.func @transform_3(%arg0: i32) -> (i32, i32) {
    %c0_i32 = arith.constant 0 : i32
    %c0_i32_0 = arith.constant 0 : i32
    return %arg0, %c0_i32 : i32, i32
  }
  func.func @transform_4(%arg0: i32) -> (i32, i32) {
    %c0_i32 = arith.constant 0 : i32
    %c0_i32_0 = arith.constant 0 : i32
    return %arg0, %c0_i32 : i32, i32
  }
}

</mosaic_0001>

<bundles_post_ra>
// kernel: residual_block_forward.3
= control target key start
LH: loop header
LB: loop body
LE: loop exit
PB: predicated region body
PF: predicated region fallthrough
CT: control target
= control target key end

     0   :  { %vm87_vm0 = vcmask 588800   ;;  %vm665_vm1 = vcmask 64512   ;;  %s2243_s1 = inlined_call_operand.vmem [shape: f32[72,8], index: 1, kind: input, shape index: {}]   ;;  %s2244_s0 = inlined_call_operand.vmem [shape: f32[512,72], index: 0, kind: input, shape index: {}]   ;;  %s2245_s2 = inlined_call_operand.vmem [shape: f32[512,8], index: 2, kind: output, shape index: {0}]   ;;  %s2246_s3 = inlined_call_operand.vmem [shape: f32[8,8], index: 3, kind: output, shape index: {1}]   ;;  %s2247_s4 = inlined_call_operand.vmem [shape: f32[8,8], index: 4, kind: output, shape index: {2}]  }
   0x1   :  { %v78_v0 = vld [vmem:[%s2243_s1] sm:$0xff]  ;;  %v79_v1 = vld [vmem:[%s2243_s1 + $0x8] sm:$0xff]  ;;  %v80_v2 = vld [vmem:[%s2243_s1 + $0x10] sm:$0xff] }
   0x2   :  { %v1325_v3 = vpack.c.bf16 %v79_v1, %v78_v0  ;;  %v81_v4 = vld [vmem:[%s2243_s1 + $0x18] sm:$0xff]  ;;  %v82_v6 = vld [vmem:[%s2243_s1 + $0x20] sm:$0xff]  ;;  %v83_v7 = vld [vmem:[%s2243_s1 + $0x28] sm:$0xff] }
   0x3   :  { %v1329_v5 = vpack.c.bf16 %v81_v4, %v80_v2  ;;  %v14_v8 = vld [vmem:[%s2244_s0] sm:$0xff]  ;;  %v1333_v9 = vpack.c.bf16 %v83_v7, %v82_v6  ;;  %v84_v10 = vld [vmem:[%s2243_s1 + $0x30] sm:$0xff]  ;;  %v85_v11 = vld [vmem:[%s2243_s1 + $0x38] sm:$0xff] }
   0x4   :  { %1326 = vmatprep.subr.bf16.mxu0 %v1325_v3  ;;  %1341 = vmatprep.subr.bf16.mxu1 %v1325_v3  ;;  %v1337_v12 = vpack.c.bf16 %v85_v11, %v84_v10  ;;  %v46_v13 = vld [vmem:[%s2244_s0 + $0x100] sm:$0xff]  ;;  %v15_v15 = vld [vmem:[%s2244_s0 + $0x8] sm:$0xff]  ;;  %v16_v16 = vld [vmem:[%s2244_s0 + $0x10] sm:$0xff] }
   0x5   :  { %1328 = vmatpush3.bf16.msra.mxu0 %v1325_v3  ;;  %1229 = vmatprep.mubr.msk.f32.mxu0 %vm87_vm0, %v14_v8  ;;  %v86_v14 = vld [vmem:[%s2243_s1 + $0x40] sm:$0xff]  ;;  %v47_v17 = vld [vmem:[%s2244_s0 + $0x108] sm:$0xff]  ;;  %v48_v18 = vld [vmem:[%s2244_s0 + $0x110] sm:$0xff] }
   0x6   :  { %1330 = vmatprep.subr.bf16.mxu0 %v1329_v5  ;;  %1346 = vmatpush3.bf16.msra.mxu1 %v1325_v3  ;;  %v17_v19 = vld [vmem:[%s2244_s0 + $0x18] sm:$0xff]  ;;  %v18_v20 = vld [vmem:[%s2244_s0 + $0x20] sm:$0xff]  ;;  %v19_v23 = vld [vmem:[%s2244_s0 + $0x28] sm:$0xff] }
   0x7   :  { %1342 = vmatprep.subr.bf16.mxu1 %v1329_v5  ;;  %1277 = vmatprep.mubr.msk.f32.mxu1 %vm87_vm0, %v46_v13  ;;  %v49_v21 = vld [vmem:[%s2244_s0 + $0x118] sm:$0xff]  ;;  %v50_v22 = vld [vmem:[%s2244_s0 + $0x120] sm:$0xff]  ;;  %v20_v24 = vld [vmem:[%s2244_s0 + $0x30] sm:$0xff] }
   0x8   :  { %v51_v25 = vld [vmem:[%s2244_s0 + $0x128] sm:$0xff]  ;;  %v52_v26 = vld [vmem:[%s2244_s0 + $0x130] sm:$0xff]  ;;  %v21_v27 = vld [vmem:[%s2244_s0 + $0x38] sm:$0xff] }
   0x9   :  { %1332 = vmatpush3.bf16.msra.mxu0 %v1329_v5  ;;  %v22_v28 = vld [vmem:[%s2244_s0 + $0x40] sm:$0xff]  ;;  %v53_v29 = vld [vmem:[%s2244_s0 + $0x138] sm:$0xff]  ;;  %v23_v31 = vld [vmem:[%s2244_s0 + $0x48] sm:$0xff] }
   0xa   :  { %1334 = vmatprep.subr.bf16.mxu0 %v1333_v9  ;;  %1347 = vmatpush3.bf16.msra.mxu1 %v1329_v5  ;;  %v54_v30 = vld [vmem:[%s2244_s0 + $0x140] sm:$0xff]  ;;  %v24_v32 = vld [vmem:[%s2244_s0 + $0x50] sm:$0xff]  ;;  %v55_v33 = vld [vmem:[%s2244_s0 + $0x148] sm:$0xff] }
   0xb   :  { %1343 = vmatprep.subr.bf16.mxu1 %v1333_v9  ;;  %v56_v34 = vld [vmem:[%s2244_s0 + $0x150] sm:$0xff]  ;;  %v25_v35 = vld [vmem:[%s2244_s0 + $0x58] sm:$0xff]  ;;  %v26_v36 = vld [vmem:[%s2244_s0 + $0x60] sm:$0xff] }
   0xc   :  { %v57_v37 = vld [vmem:[%s2244_s0 + $0x158] sm:$0xff]  ;;  %v58_v38 = vld [vmem:[%s2244_s0 + $0x160] sm:$0xff]  ;;  %v27_v39 = vld [vmem:[%s2244_s0 + $0x68] sm:$0xff] }
   0xd   :  { %1336 = vmatpush3.bf16.msra.mxu0 %v1333_v9  ;;  %v28_v40 = vld [vmem:[%s2244_s0 + $0x70] sm:$0xff]  ;;  %v59_v41 = vld [vmem:[%s2244_s0 + $0x168] sm:$0xff]  ;;  %v29_v43 = vld [vmem:[%s2244_s0 + $0x78] sm:$0xff] }
   0xe   :  { %1338 = vmatprep.subr.bf16.mxu0 %v1337_v12  ;;  %1348 = vmatpush3.bf16.msra.mxu1 %v1333_v9  ;;  %v60_v42 = vld [vmem:[%s2244_s0 + $0x170] sm:$0xff]  ;;  %v30_v44 = vld [vmem:[%s2244_s0 + $0x80] sm:$0xff]  ;;  %v61_v45 = vld [vmem:[%s2244_s0 + $0x178] sm:$0xff] }
   0xf   :  { %1344 = vmatprep.subr.bf16.mxu1 %v1337_v12  ;;  %v62_v46 = vld [vmem:[%s2244_s0 + $0x180] sm:$0xff]  ;;  %v31_v47 = vld [vmem:[%s2244_s0 + $0x88] sm:$0xff]  ;;  %v32_v48 = vld [vmem:[%s2244_s0 + $0x90] sm:$0xff] }
  0x10   :  { %v63_v49 = vld [vmem:[%s2244_s0 + $0x188] sm:$0xff]  ;;  %v64_v50 = vld [vmem:[%s2244_s0 + $0x190] sm:$0xff]  ;;  %v33_v51 = vld [vmem:[%s2244_s0 + $0x98] sm:$0xff] }
  0x11   :  { %1340 = vmatpush3.bf16.msra.mxu0 %v1337_v12  ;;  %v34_v52 = vld [vmem:[%s2244_s0 + $0xa0] sm:$0xff]  ;;  %v65_v53 = vld [vmem:[%s2244_s0 + $0x198] sm:$0xff]  ;;  %v35_v55 = vld [vmem:[%s2244_s0 + $0xa8] sm:$0xff] }
  0x12   :  { %1227 = vmatprep.subr.mxu0 %v86_v14  ;;  %1349 = vmatpush3.bf16.msra.mxu1 %v1337_v12  ;;  %v66_v54 = vld [vmem:[%s2244_s0 + $0x1a0] sm:$0xff]  ;;  %v36_v56 = vld [vmem:[%s2244_s0 + $0xb0] sm:$0xff]  ;;  %v67_v57 = vld [vmem:[%s2244_s0 + $0x1a8] sm:$0xff] }
  0x13   :  { %1345 = vmatprep.subr.mxu1 %v86_v14  ;;  %v68_v58 = vld [vmem:[%s2244_s0 + $0x1b0] sm:$0xff]  ;;  %v37_v59 = vld [vmem:[%s2244_s0 + $0xb8] sm:$0xff]  ;;  %v38_v60 = vld [vmem:[%s2244_s0 + $0xc0] sm:$0xff] }
  0x14   :  { %v69_v61 = vld [vmem:[%s2244_s0 + $0x1b8] sm:$0xff]  ;;  %v70_v62 = vld [vmem:[%s2244_s0 + $0x1c0] sm:$0xff]  ;;  %v39_v63 = vld [vmem:[%s2244_s0 + $0xc8] sm:$0xff] }
  0x15   :  { %1228 = vmatpush3.msra.mxu0 %v86_v14  ;;  %v40_v0 = vld [vmem:[%s2244_s0 + $0xd0] sm:$0xff]  ;;  %v71_v1 = vld [vmem:[%s2244_s0 + $0x1c8] sm:$0xff]  ;;  %v41_v3 = vld [vmem:[%s2244_s0 + $0xd8] sm:$0xff] }
  0x16   :  { %1230 = vmatmul.mubr.msk.f32.vlgmr.msra.gmra.mrb[0].mxu0 %vm87_vm0, %v15_v15  ;;  %1350 = vmatpush3.msra.mxu1 %v86_v14  ;;  %v72_v2 = vld [vmem:[%s2244_s0 + $0x1d0] sm:$0xff]  ;;  %v42_v4 = vld [vmem:[%s2244_s0 + $0xe0] sm:$0xff]  ;;  %v73_v5 = vld [vmem:[%s2244_s0 + $0x1d8] sm:$0xff] }
  0x17   :  { %1232 = vmatprep.mubr.msk.f32.mxu0 %vm87_vm0, %v16_v16  ;;  %1278 = vmatmul.mubr.msk.f32.vlgmr.msra.gmra.mrb[0].mxu1 %vm87_vm0, %v47_v17  ;;  %v74_v6 = vld [vmem:[%s2244_s0 + $0x1e0] sm:$0xff]  ;;  %v43_v7 = vld [vmem:[%s2244_s0 + $0xe8] sm:$0xff]  ;;  %v44_v8 = vld [vmem:[%s2244_s0 + $0xf0] sm:$0xff] }
  0x18   :  { %1280 = vmatprep.mubr.msk.f32.mxu1 %vm87_vm0, %v48_v18  ;;  %v75_v9 = vld [vmem:[%s2244_s0 + $0x1e8] sm:$0xff]  ;;  %v76_v10 = vld [vmem:[%s2244_s0 + $0x1f0] sm:$0xff]  ;;  %v45_v11 = vld [vmem:[%s2244_s0 + $0xf8] sm:$0xff] }
  0x19   :  { %v77_v12 = vld [vmem:[%s2244_s0 + $0x1f8] sm:$0xff] }
  0x1a   :  { %1233 = vmatmul.mubr.msk.f32.gmra.mrb[2].mxu0 %vm87_vm0, %v17_v19 }
  0x1b   :  { %1235 = vmatprep.mubr.msk.f32.mxu0 %vm87_vm0, %v18_v20  ;;  %1281 = vmatmul.mubr.msk.f32.gmra.mrb[2].mxu1 %vm87_vm0, %v49_v21 }
  0x1c   :  { %1283 = vmatprep.mubr.msk.f32.mxu1 %vm87_vm0, %v50_v22 }
  0x1e   :  { %1236 = vmatmul.mubr.msk.f32.gmra.mrb[4].mxu0 %vm87_vm0, %v19_v23 }
  0x1f   :  { %1238 = vmatprep.mubr.msk.f32.mxu0 %vm87_vm0, %v20_v24  ;;  %1284 = vmatmul.mubr.msk.f32.gmra.mrb[4].mxu1 %vm87_vm0, %v51_v25 }
  0x20   :  { %1286 = vmatprep.mubr.msk.f32.mxu1 %vm87_vm0, %v52_v26 }
  0x22   :  { %1239 = vmatmul.mubr.msk.f32.gmra.mrb[6].mxu0 %vm87_vm0, %v21_v27 }
  0x23   :  { %1241 = vmatprep.mubr.msk.f32.mxu0 %vm87_vm0, %v22_v28  ;;  %1287 = vmatmul.mubr.msk.f32.gmra.mrb[6].mxu1 %vm87_vm0, %v53_v29 }
  0x24   :  { %1289 = vmatprep.mubr.msk.f32.mxu1 %vm87_vm0, %v54_v30 }
  0x26   :  { %1242 = vmatmul.mubr.msk.f32.gmra.mrb[8].mxu0 %vm87_vm0, %v23_v31 }
  0x27   :  { %1244 = vmatprep.mubr.msk.f32.mxu0 %vm87_vm0, %v24_v32  ;;  %1290 = vmatmul.mubr.msk.f32.gmra.mrb[8].mxu1 %vm87_vm0, %v55_v33 }
  0x28   :  { %1292 = vmatprep.mubr.msk.f32.mxu1 %vm87_vm0, %v56_v34 }
  0x2a   :  { %1245 = vmatmul.mubr.msk.f32.gmra.mrb[10].mxu0 %vm87_vm0, %v25_v35 }
  0x2b   :  { %1247 = vmatprep.mubr.msk.f32.mxu0 %vm87_vm0, %v26_v36  ;;  %1293 = vmatmul.mubr.msk.f32.gmra.mrb[10].mxu1 %vm87_vm0, %v57_v37 }
  0x2c   :  { %1295 = vmatprep.mubr.msk.f32.mxu1 %vm87_vm0, %v58_v38 }
  0x2e   :  { %1248 = vmatmul.mubr.msk.f32.gmra.mrb[12].mxu0 %vm87_vm0, %v27_v39 }
  0x2f   :  { %1250 = vmatprep.mubr.msk.f32.mxu0 %vm87_vm0, %v28_v40  ;;  %1296 = vmatmul.mubr.msk.f32.gmra.mrb[12].mxu1 %vm87_vm0, %v59_v41 }
  0x30   :  { %1298 = vmatprep.mubr.msk.f32.mxu1 %vm87_vm0, %v60_v42 }
  0x32   :  { %1251 = vmatmul.mubr.msk.f32.gmra.mrb[14].mxu0 %vm87_vm0, %v29_v43 }
  0x33   :  { %1253 = vmatprep.mubr.msk.f32.mxu0 %vm87_vm0, %v30_v44  ;;  %1299 = vmatmul.mubr.msk.f32.gmra.mrb[14].mxu1 %vm87_vm0, %v61_v45 }
  0x34   :  { %1301 = vmatprep.mubr.msk.f32.mxu1 %vm87_vm0, %v62_v46 }
  0x36   :  { %1254 = vmatmul.mubr.msk.f32.gmra.mrb[16].mxu0 %vm87_vm0, %v31_v47 }
  0x37   :  { %1256 = vmatprep.mubr.msk.f32.mxu0 %vm87_vm0, %v32_v48  ;;  %1302 = vmatmul.mubr.msk.f32.gmra.mrb[16].mxu1 %vm87_vm0, %v63_v49 }
  0x38   :  { %1304 = vmatprep.mubr.msk.f32.mxu1 %vm87_vm0, %v64_v50 }
  0x3a   :  { %1257 = vmatmul.mubr.msk.f32.gmra.mrb[18].mxu0 %vm87_vm0, %v33_v51 }
  0x3b   :  { %1259 = vmatprep.mubr.msk.f32.mxu0 %vm87_vm0, %v34_v52  ;;  %1305 = vmatmul.mubr.msk.f32.gmra.mrb[18].mxu1 %vm87_vm0, %v65_v53 }
  0x3c   :  { %1307 = vmatprep.mubr.msk.f32.mxu1 %vm87_vm0, %v66_v54 }
  0x3e   :  { %1260 = vmatmul.mubr.msk.f32.gmra.mrb[20].mxu0 %vm87_vm0, %v35_v55 }
  0x3f   :  { %1262 = vmatprep.mubr.msk.f32.mxu0 %vm87_vm0, %v36_v56  ;;  %1308 = vmatmul.mubr.msk.f32.gmra.mrb[20].mxu1 %vm87_vm0, %v67_v57 }
  0x40   :  { %1310 = vmatprep.mubr.msk.f32.mxu1 %vm87_vm0, %v68_v58 }
  0x42   :  { %1263 = vmatmul.mubr.msk.f32.gmra.mrb[22].mxu0 %vm87_vm0, %v37_v59 }
  0x43   :  { %1265 = vmatprep.mubr.msk.f32.mxu0 %vm87_vm0, %v38_v60  ;;  %1311 = vmatmul.mubr.msk.f32.gmra.mrb[22].mxu1 %vm87_vm0, %v69_v61 }
  0x44   :  { %1313 = vmatprep.mubr.msk.f32.mxu1 %vm87_vm0, %v70_v62 }
  0x46   :  { %1266 = vmatmul.mubr.msk.f32.gmra.mrb[24].mxu0 %vm87_vm0, %v39_v63 }
  0x47   :  { %1268 = vmatprep.mubr.msk.f32.mxu0 %vm87_vm0, %v40_v0  ;;  %1314 = vmatmul.mubr.msk.f32.gmra.mrb[24].mxu1 %vm87_vm0, %v71_v1 }
  0x48   :  { %1316 = vmatprep.mubr.msk.f32.mxu1 %vm87_vm0, %v72_v2 }
  0x4a   :  { %1269 = vmatmul.mubr.msk.f32.gmra.mrb[26].mxu0 %vm87_vm0, %v41_v3 }
  0x4b   :  { %1271 = vmatprep.mubr.msk.f32.mxu0 %vm87_vm0, %v42_v4  ;;  %1317 = vmatmul.mubr.msk.f32.gmra.mrb[26].mxu1 %vm87_vm0, %v73_v5 }
  0x4c   :  { %1319 = vmatprep.mubr.msk.f32.mxu1 %vm87_vm0, %v74_v6 }
  0x4e   :  { %1272 = vmatmul.mubr.msk.f32.gmra.mrb[28].mxu0 %vm87_vm0, %v43_v7 }
  0x4f   :  { %1274 = vmatprep.mubr.msk.f32.mxu0 %vm87_vm0, %v44_v8  ;;  %1320 = vmatmul.mubr.msk.f32.gmra.mrb[28].mxu1 %vm87_vm0, %v75_v9 }
  0x50   :  { %1322 = vmatprep.mubr.msk.f32.mxu1 %vm87_vm0, %v76_v10 }
  0x52   :  { %1275 = vmatmul.mubr.msk.f32.gmra.mrb[30].mxu0 %vm87_vm0, %v45_v11 }
  0x53   :  { %1323 = vmatmul.mubr.msk.f32.gmra.mrb[30].mxu1 %vm87_vm0, %v77_v12 }
  0xe9   :  { %v1231_v13 = vpop.f32.mrb[0].mxu0 }
  0xea   :  { %667 = vst.msk [vmem:[%s2245_s2 + $0x8] sm:$0xff] %vm665_vm1, %v1231_v13  ;;  %v731_v14 = vsel %vm665_vm1, %v1231_v13, 0.0  ;;  %v864_v15 = vmul.f32 %v1231_v13, %v1231_v13  ;;  %v346_v16 = vpop.f32.mrb[1].mxu0  ;;  %v1664_v17 = vpop.f32.mrb[0].mxu1 }
  0xeb   :  { %666 = vst.msk [vmem:[%s2245_s2] sm:$0xff] %vm665_vm1, %v346_v16  ;;  %v730_v18 = vsel %vm665_vm1, %v346_v16, 0.0  ;;  %v863_v19 = vmul.f32 %v346_v16, %v346_v16  ;;  %699 = vst.msk [vmem:[%s2245_s2 + $0x108] sm:$0xff] %vm665_vm1, %v1664_v17  ;;  %v1676_v20 = vpop.f32.mrb[1].mxu1 }
  0xec   :  { %v928_v21 = vsel %vm665_vm1, %v864_v15, 0.0  ;;  %v732_v22 = vadd.f32 %v731_v14, %v730_v18  ;;  %698 = vst.msk [vmem:[%s2245_s2 + $0x100] sm:$0xff] %vm665_vm1, %v1676_v20 }
  0xed   :  { %v927_v23 = vsel %vm665_vm1, %v863_v19, 0.0  ;;  %v1234_v24 = vpop.f32.mrb[2].mxu0 }
  0xee   :  { %v929_v25 = vadd.f32 %v928_v21, %v927_v23  ;;  %669 = vst.msk [vmem:[%s2245_s2 + $0x18] sm:$0xff] %vm665_vm1, %v1234_v24  ;;  %v356_v26 = vpop.f32.mrb[3].mxu0  ;;  %v1689_v27 = vpop.f32.mrb[2].mxu1  ;;  %v866_v28 = vmul.f32 %v1234_v24, %v1234_v24  ;;  %v735_v33 = vsel %vm665_vm1, %v1234_v24, 0.0 }
  0xef   :  { %668 = vst.msk [vmem:[%s2245_s2 + $0x10] sm:$0xff] %vm665_vm1, %v356_v26  ;;  %v733_v29 = vsel %vm665_vm1, %v356_v26, 0.0  ;;  %v865_v30 = vmul.f32 %v356_v26, %v356_v26  ;;  %701 = vst.msk [vmem:[%s2245_s2 + $0x118] sm:$0xff] %vm665_vm1, %v1689_v27  ;;  %v1701_v31 = vpop.f32.mrb[3].mxu1 }
  0xf0   :  { %v734_v32 = vadd.f32 %v733_v29, %v732_v22  ;;  %700 = vst.msk [vmem:[%s2245_s2 + $0x110] sm:$0xff] %vm665_vm1, %v1701_v31  ;;  %v932_v40 = vsel %vm665_vm1, %v866_v28, 0.0 }
  0xf1   :  { %v930_v34 = vsel %vm665_vm1, %v865_v30, 0.0  ;;  %v1237_v35 = vpop.f32.mrb[4].mxu0 }
  0xf2   :  { %v931_v36 = vadd.f32 %v930_v34, %v929_v25  ;;  %671 = vst.msk [vmem:[%s2245_s2 + $0x28] sm:$0xff] %vm665_vm1, %v1237_v35  ;;  %v366_v37 = vpop.f32.mrb[5].mxu0  ;;  %v736_v38 = vadd.f32 %v735_v33, %v734_v32  ;;  %v1714_v39 = vpop.f32.mrb[4].mxu1  ;;  %v868_v41 = vmul.f32 %v1237_v35, %v1237_v35  ;;  %v739_v47 = vsel %vm665_vm1, %v1237_v35, 0.0 }
  0xf3   :  { %670 = vst.msk [vmem:[%s2245_s2 + $0x20] sm:$0xff] %vm665_vm1, %v366_v37  ;;  %v737_v42 = vsel %vm665_vm1, %v366_v37, 0.0  ;;  %v867_v43 = vmul.f32 %v366_v37, %v366_v37  ;;  %703 = vst.msk [vmem:[%s2245_s2 + $0x128] sm:$0xff] %vm665_vm1, %v1714_v39  ;;  %v1727_v44 = vpop.f32.mrb[5].mxu1 }
  0xf4   :  { %v738_v45 = vadd.f32 %v737_v42, %v736_v38  ;;  %v933_v46 = vadd.f32 %v932_v40, %v931_v36  ;;  %702 = vst.msk [vmem:[%s2245_s2 + $0x120] sm:$0xff] %vm665_vm1, %v1727_v44  ;;  %v936_v54 = vsel %vm665_vm1, %v868_v41, 0.0 }
  0xf5   :  { %v934_v48 = vsel %vm665_vm1, %v867_v43, 0.0  ;;  %v1240_v49 = vpop.f32.mrb[6].mxu0 }
  0xf6   :  { %v935_v50 = vadd.f32 %v934_v48, %v933_v46  ;;  %673 = vst.msk [vmem:[%s2245_s2 + $0x38] sm:$0xff] %vm665_vm1, %v1240_v49  ;;  %v376_v51 = vpop.f32.mrb[7].mxu0  ;;  %v740_v52 = vadd.f32 %v739_v47, %v738_v45  ;;  %v1740_v53 = vpop.f32.mrb[6].mxu1  ;;  %v870_v55 = vmul.f32 %v1240_v49, %v1240_v49  ;;  %v743_v61 = vsel %vm665_vm1, %v1240_v49, 0.0 }
  0xf7   :  { %672 = vst.msk [vmem:[%s2245_s2 + $0x30] sm:$0xff] %vm665_vm1, %v376_v51  ;;  %v741_v56 = vsel %vm665_vm1, %v376_v51, 0.0  ;;  %v869_v57 = vmul.f32 %v376_v51, %v376_v51  ;;  %705 = vst.msk [vmem:[%s2245_s2 + $0x138] sm:$0xff] %vm665_vm1, %v1740_v53  ;;  %v1753_v58 = vpop.f32.mrb[7].mxu1 }
  0xf8   :  { %v742_v59 = vadd.f32 %v741_v56, %v740_v52  ;;  %v937_v60 = vadd.f32 %v936_v54, %v935_v50  ;;  %704 = vst.msk [vmem:[%s2245_s2 + $0x130] sm:$0xff] %vm665_vm1, %v1753_v58  ;;  %v940_v4 = vsel %vm665_vm1, %v870_v55, 0.0 }
  0xf9   :  { %v938_v62 = vsel %vm665_vm1, %v869_v57, 0.0  ;;  %v1243_v63 = vpop.f32.mrb[8].mxu0 }
  0xfa   :  { %v939_v0 = vadd.f32 %v938_v62, %v937_v60  ;;  %675 = vst.msk [vmem:[%s2245_s2 + $0x48] sm:$0xff] %vm665_vm1, %v1243_v63  ;;  %v386_v1 = vpop.f32.mrb[9].mxu0  ;;  %v744_v2 = vadd.f32 %v743_v61, %v742_v59  ;;  %v1766_v3 = vpop.f32.mrb[8].mxu1  ;;  %v872_v5 = vmul.f32 %v1243_v63, %v1243_v63  ;;  %v747_v11 = vsel %vm665_vm1, %v1243_v63, 0.0 }
  0xfb   :  { %674 = vst.msk [vmem:[%s2245_s2 + $0x40] sm:$0xff] %vm665_vm1, %v386_v1  ;;  %v745_v6 = vsel %vm665_vm1, %v386_v1, 0.0  ;;  %v871_v7 = vmul.f32 %v386_v1, %v386_v1  ;;  %707 = vst.msk [vmem:[%s2245_s2 + $0x148] sm:$0xff] %vm665_vm1, %v1766_v3  ;;  %v1779_v8 = vpop.f32.mrb[9].mxu1 }
  0xfc   :  { %v746_v9 = vadd.f32 %v745_v6, %v744_v2  ;;  %v941_v10 = vadd.f32 %v940_v4, %v939_v0  ;;  %706 = vst.msk [vmem:[%s2245_s2 + $0x140] sm:$0xff] %vm665_vm1, %v1779_v8  ;;  %v944_v19 = vsel %vm665_vm1, %v872_v5, 0.0 }
  0xfd   :  { %v942_v12 = vsel %vm665_vm1, %v871_v7, 0.0  ;;  %v1246_v13 = vpop.f32.mrb[10].mxu0 }
  0xfe   :  { %v943_v14 = vadd.f32 %v942_v12, %v941_v10  ;;  %677 = vst.msk [vmem:[%s2245_s2 + $0x58] sm:$0xff] %vm665_vm1, %v1246_v13  ;;  %v396_v15 = vpop.f32.mrb[11].mxu0  ;;  %v748_v16 = vadd.f32 %v747_v11, %v746_v9  ;;  %v1792_v18 = vpop.f32.mrb[10].mxu1  ;;  %v874_v21 = vmul.f32 %v1246_v13, %v1246_v13  ;;  %v751_v28 = vsel %vm665_vm1, %v1246_v13, 0.0 }
  0xff   :  { %676 = vst.msk [vmem:[%s2245_s2 + $0x50] sm:$0xff] %vm665_vm1, %v396_v15  ;;  %v749_v22 = vsel %vm665_vm1, %v396_v15, 0.0  ;;  %v873_v23 = vmul.f32 %v396_v15, %v396_v15  ;;  %709 = vst.msk [vmem:[%s2245_s2 + $0x158] sm:$0xff] %vm665_vm1, %v1792_v18  ;;  %v1805_v24 = vpop.f32.mrb[11].mxu1 }
 0x100   :  { %v750_v25 = vadd.f32 %v749_v22, %v748_v16  ;;  %v945_v26 = vadd.f32 %v944_v19, %v943_v14  ;;  %708 = vst.msk [vmem:[%s2245_s2 + $0x150] sm:$0xff] %vm665_vm1, %v1805_v24  ;;  %v948_v36 = vsel %vm665_vm1, %v874_v21, 0.0 }
 0x101   :  { %v946_v29 = vsel %vm665_vm1, %v873_v23, 0.0  ;;  %v1249_v30 = vpop.f32.mrb[12].mxu0 }
 0x102   :  { %v947_v32 = vadd.f32 %v946_v29, %v945_v26  ;;  %679 = vst.msk [vmem:[%s2245_s2 + $0x68] sm:$0xff] %vm665_vm1, %v1249_v30  ;;  %v406_v33 = vpop.f32.mrb[13].mxu0  ;;  %v752_v34 = vadd.f32 %v751_v28, %v750_v25  ;;  %v1818_v35 = vpop.f32.mrb[12].mxu1  ;;  %v876_v37 = vmul.f32 %v1249_v30, %v1249_v30  ;;  %v755_v45 = vsel %vm665_vm1, %v1249_v30, 0.0 }
 0x103   :  { %678 = vst.msk [vmem:[%s2245_s2 + $0x60] sm:$0xff] %vm665_vm1, %v406_v33  ;;  %v753_v38 = vsel %vm665_vm1, %v406_v33, 0.0  ;;  %v875_v40 = vmul.f32 %v406_v33, %v406_v33  ;;  %711 = vst.msk [vmem:[%s2245_s2 + $0x168] sm:$0xff] %vm665_vm1, %v1818_v35  ;;  %v1831_v41 = vpop.f32.mrb[13].mxu1 }
 0x104   :  { %v754_v42 = vadd.f32 %v753_v38, %v752_v34  ;;  %v949_v43 = vadd.f32 %v948_v36, %v947_v32  ;;  %710 = vst.msk [vmem:[%s2245_s2 + $0x160] sm:$0xff] %vm665_vm1, %v1831_v41  ;;  %v952_v52 = vsel %vm665_vm1, %v876_v37, 0.0 }
 0x105   :  { %v950_v46 = vsel %vm665_vm1, %v875_v40, 0.0  ;;  %v1252_v47 = vpop.f32.mrb[14].mxu0 }
 0x106   :  { %v951_v48 = vadd.f32 %v950_v46, %v949_v43  ;;  %681 = vst.msk [vmem:[%s2245_s2 + $0x78] sm:$0xff] %vm665_vm1, %v1252_v47  ;;  %v416_v49 = vpop.f32.mrb[15].mxu0  ;;  %v756_v50 = vadd.f32 %v755_v45, %v754_v42  ;;  %v1844_v51 = vpop.f32.mrb[14].mxu1  ;;  %v878_v54 = vmul.f32 %v1252_v47, %v1252_v47  ;;  %v759_v61 = vsel %vm665_vm1, %v1252_v47, 0.0 }
 0x107   :  { %680 = vst.msk [vmem:[%s2245_s2 + $0x70] sm:$0xff] %vm665_vm1, %v416_v49  ;;  %v757_v55 = vsel %vm665_vm1, %v416_v49, 0.0  ;;  %v877_v56 = vmul.f32 %v416_v49, %v416_v49  ;;  %713 = vst.msk [vmem:[%s2245_s2 + $0x178] sm:$0xff] %vm665_vm1, %v1844_v51  ;;  %v1857_v57 = vpop.f32.mrb[15].mxu1 }
 0x108   :  { %v758_v59 = vadd.f32 %v757_v55, %v756_v50  ;;  %v953_v60 = vadd.f32 %v952_v52, %v951_v48  ;;  %712 = vst.msk [vmem:[%s2245_s2 + $0x170] sm:$0xff] %vm665_vm1, %v1857_v57  ;;  %v956_v5 = vsel %vm665_vm1, %v878_v54, 0.0 }
 0x109   :  { %v954_v62 = vsel %vm665_vm1, %v877_v56, 0.0  ;;  %v1255_v63 = vpop.f32.mrb[16].mxu0 }
 0x10a   :  { %v955_v0 = vadd.f32 %v954_v62, %v953_v60  ;;  %683 = vst.msk [vmem:[%s2245_s2 + $0x88] sm:$0xff] %vm665_vm1, %v1255_v63  ;;  %v426_v1 = vpop.f32.mrb[17].mxu0  ;;  %v760_v2 = vadd.f32 %v759_v61, %v758_v59  ;;  %v1870_v4 = vpop.f32.mrb[16].mxu1  ;;  %v880_v6 = vmul.f32 %v1255_v63, %v1255_v63  ;;  %v763_v13 = vsel %vm665_vm1, %v1255_v63, 0.0 }
 0x10b   :  { %682 = vst.msk [vmem:[%s2245_s2 + $0x80] sm:$0xff] %vm665_vm1, %v426_v1  ;;  %v761_v7 = vsel %vm665_vm1, %v426_v1, 0.0  ;;  %v879_v9 = vmul.f32 %v426_v1, %v426_v1  ;;  %715 = vst.msk [vmem:[%s2245_s2 + $0x188] sm:$0xff] %vm665_vm1, %v1870_v4  ;;  %v1883_v10 = vpop.f32.mrb[17].mxu1 }
 0x10c   :  { %v762_v11 = vadd.f32 %v761_v7, %v760_v2  ;;  %v957_v12 = vadd.f32 %v956_v5, %v955_v0  ;;  %714 = vst.msk [vmem:[%s2245_s2 + $0x180] sm:$0xff] %vm665_vm1, %v1883_v10  ;;  %v960_v23 = vsel %vm665_vm1, %v880_v6, 0.0 }
 0x10d   :  { %v958_v14 = vsel %vm665_vm1, %v879_v9, 0.0  ;;  %v1258_v15 = vpop.f32.mrb[18].mxu0 }
 0x10e   :  { %v959_v16 = vadd.f32 %v958_v14, %v957_v12  ;;  %685 = vst.msk [vmem:[%s2245_s2 + $0x98] sm:$0xff] %vm665_vm1, %v1258_v15  ;;  %v436_v19 = vpop.f32.mrb[19].mxu0  ;;  %v764_v21 = vadd.f32 %v763_v13, %v762_v11  ;;  %v1896_v22 = vpop.f32.mrb[18].mxu1  ;;  %v882_v25 = vmul.f32 %v1258_v15, %v1258_v15  ;;  %v767_v33 = vsel %vm665_vm1, %v1258_v15, 0.0 }
 0x10f   :  { %684 = vst.msk [vmem:[%s2245_s2 + $0x90] sm:$0xff] %vm665_vm1, %v436_v19  ;;  %v765_v26 = vsel %vm665_vm1, %v436_v19, 0.0  ;;  %v881_v28 = vmul.f32 %v436_v19, %v436_v19  ;;  %717 = vst.msk [vmem:[%s2245_s2 + $0x198] sm:$0xff] %vm665_vm1, %v1896_v22  ;;  %v1909_v29 = vpop.f32.mrb[19].mxu1 }
 0x110   :  { %v766_v30 = vadd.f32 %v765_v26, %v764_v21  ;;  %v961_v32 = vadd.f32 %v960_v23, %v959_v16  ;;  %716 = vst.msk [vmem:[%s2245_s2 + $0x190] sm:$0xff] %vm665_vm1, %v1909_v29  ;;  %v964_v43 = vsel %vm665_vm1, %v882_v25, 0.0 }
 0x111   :  { %v962_v34 = vsel %vm665_vm1, %v881_v28, 0.0  ;;  %v1261_v36 = vpop.f32.mrb[20].mxu0 }
 0x112   :  { %v963_v37 = vadd.f32 %v962_v34, %v961_v32  ;;  %687 = vst.msk [vmem:[%s2245_s2 + $0xa8] sm:$0xff] %vm665_vm1, %v1261_v36  ;;  %v446_v38 = vpop.f32.mrb[21].mxu0  ;;  %v768_v40 = vadd.f32 %v767_v33, %v766_v30  ;;  %v1922_v42 = vpop.f32.mrb[20].mxu1  ;;  %v884_v45 = vmul.f32 %v1261_v36, %v1261_v36  ;;  %v771_v52 = vsel %vm665_vm1, %v1261_v36, 0.0 }
 0x113   :  { %686 = vst.msk [vmem:[%s2245_s2 + $0xa0] sm:$0xff] %vm665_vm1, %v446_v38  ;;  %v769_v46 = vsel %vm665_vm1, %v446_v38, 0.0  ;;  %v883_v47 = vmul.f32 %v446_v38, %v446_v38  ;;  %719 = vst.msk [vmem:[%s2245_s2 + $0x1a8] sm:$0xff] %vm665_vm1, %v1922_v42  ;;  %v1935_v48 = vpop.f32.mrb[21].mxu1 }
 0x114   :  { %v770_v49 = vadd.f32 %v769_v46, %v768_v40  ;;  %v965_v50 = vadd.f32 %v964_v43, %v963_v37  ;;  %718 = vst.msk [vmem:[%s2245_s2 + $0x1a0] sm:$0xff] %vm665_vm1, %v1935_v48  ;;  %v968_v62 = vsel %vm665_vm1, %v884_v45, 0.0 }
 0x115   :  { %v966_v54 = vsel %vm665_vm1, %v883_v47, 0.0  ;;  %v1264_v55 = vpop.f32.mrb[22].mxu0 }
 0x116   :  { %v967_v56 = vadd.f32 %v966_v54, %v965_v50  ;;  %689 = vst.msk [vmem:[%s2245_s2 + $0xb8] sm:$0xff] %vm665_vm1, %v1264_v55  ;;  %v456_v59 = vpop.f32.mrb[23].mxu0  ;;  %v772_v60 = vadd.f32 %v771_v52, %v770_v49  ;;  %v1948_v61 = vpop.f32.mrb[22].mxu1  ;;  %v886_v63 = vmul.f32 %v1264_v55, %v1264_v55  ;;  %v775_v7 = vsel %vm665_vm1, %v1264_v55, 0.0 }
 0x117   :  { %688 = vst.msk [vmem:[%s2245_s2 + $0xb0] sm:$0xff] %vm665_vm1, %v456_v59  ;;  %v773_v0 = vsel %vm665_vm1, %v456_v59, 0.0  ;;  %v885_v1 = vmul.f32 %v456_v59, %v456_v59  ;;  %721 = vst.msk [vmem:[%s2245_s2 + $0x1b8] sm:$0xff] %vm665_vm1, %v1948_v61  ;;  %v1961_v2 = vpop.f32.mrb[23].mxu1 }
 0x118   :  { %v774_v5 = vadd.f32 %v773_v0, %v772_v60  ;;  %v969_v6 = vadd.f32 %v968_v62, %v967_v56  ;;  %720 = vst.msk [vmem:[%s2245_s2 + $0x1b0] sm:$0xff] %vm665_vm1, %v1961_v2  ;;  %v972_v16 = vsel %vm665_vm1, %v886_v63, 0.0 }
 0x119   :  { %v970_v9 = vsel %vm665_vm1, %v885_v1, 0.0  ;;  %v1267_v11 = vpop.f32.mrb[24].mxu0 }
 0x11a   :  { %v971_v12 = vadd.f32 %v970_v9, %v969_v6  ;;  %691 = vst.msk [vmem:[%s2245_s2 + $0xc8] sm:$0xff] %vm665_vm1, %v1267_v11  ;;  %v466_v13 = vpop.f32.mrb[25].mxu0  ;;  %v776_v14 = vadd.f32 %v775_v7, %v774_v5  ;;  %v1974_v15 = vpop.f32.mrb[24].mxu1  ;;  %v888_v19 = vmul.f32 %v1267_v11, %v1267_v11  ;;  %v779_v30 = vsel %vm665_vm1, %v1267_v11, 0.0 }
 0x11b   :  { %690 = vst.msk [vmem:[%s2245_s2 + $0xc0] sm:$0xff] %vm665_vm1, %v466_v13  ;;  %v777_v21 = vsel %vm665_vm1, %v466_v13, 0.0  ;;  %v887_v23 = vmul.f32 %v466_v13, %v466_v13  ;;  %723 = vst.msk [vmem:[%s2245_s2 + $0x1c8] sm:$0xff] %vm665_vm1, %v1974_v15  ;;  %v1987_v25 = vpop.f32.mrb[25].mxu1 }
 0x11c   :  { %v778_v26 = vadd.f32 %v777_v21, %v776_v14  ;;  %v973_v28 = vadd.f32 %v972_v16, %v971_v12  ;;  %722 = vst.msk [vmem:[%s2245_s2 + $0x1c0] sm:$0xff] %vm665_vm1, %v1987_v25  ;;  %v976_v40 = vsel %vm665_vm1, %v888_v19, 0.0  ;;  %v895_v21 = vmul.f32 %v1676_v20, %v1676_v20 }
 0x11d   :  { %v974_v32 = vsel %vm665_vm1, %v887_v23, 0.0  ;;  %v1270_v33 = vpop.f32.mrb[26].mxu0 }
 0x11e   :  { %v975_v34 = vadd.f32 %v974_v32, %v973_v28  ;;  %693 = vst.msk [vmem:[%s2245_s2 + $0xd8] sm:$0xff] %vm665_vm1, %v1270_v33  ;;  %v476_v36 = vpop.f32.mrb[27].mxu0  ;;  %v780_v37 = vadd.f32 %v779_v30, %v778_v26  ;;  %v2000_v38 = vpop.f32.mrb[26].mxu1  ;;  %v890_v43 = vmul.f32 %v1270_v33, %v1270_v33  ;;  %v783_v52 = vsel %vm665_vm1, %v1270_v33, 0.0 }
 0x11f   :  { %692 = vst.msk [vmem:[%s2245_s2 + $0xd0] sm:$0xff] %vm665_vm1, %v476_v36  ;;  %v781_v45 = vsel %vm665_vm1, %v476_v36, 0.0  ;;  %v889_v46 = vmul.f32 %v476_v36, %v476_v36  ;;  %725 = vst.msk [vmem:[%s2245_s2 + $0x1d8] sm:$0xff] %vm665_vm1, %v2000_v38  ;;  %v2013_v47 = vpop.f32.mrb[27].mxu1 }
 0x120   :  { %v782_v49 = vadd.f32 %v781_v45, %v780_v37  ;;  %v977_v50 = vadd.f32 %v976_v40, %v975_v34  ;;  %724 = vst.msk [vmem:[%s2245_s2 + $0x1d0] sm:$0xff] %vm665_vm1, %v2013_v47  ;;  %v980_v63 = vsel %vm665_vm1, %v890_v43, 0.0  ;;  %v793_v43 = vsel %vm665_vm1, %v1676_v20, 0.0 }
 0x121   :  { %v978_v54 = vsel %vm665_vm1, %v889_v46, 0.0  ;;  %v1273_v55 = vpop.f32.mrb[28].mxu0  ;;  %v797_v20 = vsel %vm665_vm1, %v1701_v31, 0.0 }
 0x122   :  { %v979_v56 = vadd.f32 %v978_v54, %v977_v50  ;;  %695 = vst.msk [vmem:[%s2245_s2 + $0xe8] sm:$0xff] %vm665_vm1, %v1273_v55  ;;  %v486_v59 = vpop.f32.mrb[29].mxu0  ;;  %v784_v60 = vadd.f32 %v783_v52, %v782_v49  ;;  %v2026_v62 = vpop.f32.mrb[28].mxu1  ;;  %v892_v0 = vmul.f32 %v1273_v55, %v1273_v55  ;;  %v787_v11 = vsel %vm665_vm1, %v1273_v55, 0.0 }
 0x123   :  { %694 = vst.msk [vmem:[%s2245_s2 + $0xe0] sm:$0xff] %vm665_vm1, %v486_v59  ;;  %v785_v1 = vsel %vm665_vm1, %v486_v59, 0.0  ;;  %v891_v5 = vmul.f32 %v486_v59, %v486_v59  ;;  %727 = vst.msk [vmem:[%s2245_s2 + $0x1e8] sm:$0xff] %vm665_vm1, %v2026_v62  ;;  %v2039_v6 = vpop.f32.mrb[29].mxu1  ;;  %v896_v50 = vmul.f32 %v1664_v17, %v1664_v17  ;;  %v990_v52 = vsel %vm665_vm1, %v895_v21, 0.0 }
 0x124   :  { %v786_v7 = vadd.f32 %v785_v1, %v784_v60  ;;  %v981_v9 = vadd.f32 %v980_v63, %v979_v56  ;;  %726 = vst.msk [vmem:[%s2245_s2 + $0x1e0] sm:$0xff] %vm665_vm1, %v2039_v6  ;;  %v984_v26 = vsel %vm665_vm1, %v892_v0, 0.0  ;;  %v897_v54 = vmul.f32 %v1701_v31, %v1701_v31 }
 0x125   :  { %v982_v12 = vsel %vm665_vm1, %v891_v5, 0.0  ;;  %v1276_v13 = vpop.f32.mrb[30].mxu0  ;;  %v795_v59 = vsel %vm665_vm1, %v1664_v17, 0.0  ;;  %v992_v0 = vsel %vm665_vm1, %v896_v50, 0.0  ;;  %v898_v1 = vmul.f32 %v1689_v27, %v1689_v27 }
 0x126   :  { %v983_v14 = vadd.f32 %v982_v12, %v981_v9  ;;  %697 = vst.msk [vmem:[%s2245_s2 + $0xf8] sm:$0xff] %vm665_vm1, %v1276_v13  ;;  %v496_v16 = vpop.f32.mrb[31].mxu0  ;;  %v788_v19 = vadd.f32 %v787_v11, %v786_v7  ;;  %v2054_v23 = vpop.f32.mrb[30].mxu1  ;;  %v894_v28 = vmul.f32 %v1276_v13, %v1276_v13  ;;  %v791_v37 = vsel %vm665_vm1, %v1276_v13, 0.0 }
 0x127   :  { %696 = vst.msk [vmem:[%s2245_s2 + $0xf0] sm:$0xff] %vm665_vm1, %v496_v16  ;;  %v789_v30 = vsel %vm665_vm1, %v496_v16, 0.0  ;;  %v893_v32 = vmul.f32 %v496_v16, %v496_v16  ;;  %729 = vst.msk [vmem:[%s2245_s2 + $0x1f8] sm:$0xff] %vm665_vm1, %v2054_v23  ;;  %v2067_v33 = vpop.f32.mrb[31].mxu1  ;;  %v994_v5 = vsel %vm665_vm1, %v897_v54, 0.0  ;;  %v899_v7 = vmul.f32 %v1727_v44, %v1727_v44 }
 0x128   :  { %v790_v34 = vadd.f32 %v789_v30, %v788_v19  ;;  %v985_v36 = vadd.f32 %v984_v26, %v983_v14  ;;  %728 = vst.msk [vmem:[%s2245_s2 + $0x1f0] sm:$0xff] %vm665_vm1, %v2067_v33  ;;  %v988_v49 = vsel %vm665_vm1, %v894_v28, 0.0  ;;  %v799_v17 = vsel %vm665_vm1, %v1689_v27, 0.0 }
 0x129   :  { %v986_v40 = vsel %vm665_vm1, %v893_v32, 0.0  ;;  %v801_v31 = vsel %vm665_vm1, %v1727_v44, 0.0  ;;  %v996_v14 = vsel %vm665_vm1, %v898_v1, 0.0  ;;  %v900_v16 = vmul.f32 %v1714_v39, %v1714_v39 }
 0x12a   :  { %v792_v45 = vadd.f32 %v791_v37, %v790_v34  ;;  %v987_v46 = vadd.f32 %v986_v40, %v985_v36  ;;  %v998_v19 = vsel %vm665_vm1, %v899_v7, 0.0  ;;  %v901_v21 = vmul.f32 %v1753_v58, %v1753_v58 }
 0x12b   :  { %v803_v27 = vsel %vm665_vm1, %v1714_v39, 0.0  ;;  %v805_v44 = vsel %vm665_vm1, %v1753_v58, 0.0  ;;  %v1000_v34 = vsel %vm665_vm1, %v900_v16, 0.0  ;;  %v902_v36 = vmul.f32 %v1740_v53, %v1740_v53 }
 0x12c   :  { %v989_v55 = vadd.f32 %v988_v49, %v987_v46  ;;  %v794_v56 = vadd.f32 %v793_v43, %v792_v45  ;;  %v1002_v37 = vsel %vm665_vm1, %v901_v21, 0.0  ;;  %v903_v40 = vmul.f32 %v1779_v8, %v1779_v8 }
 0x12d   :  { %v807_v39 = vsel %vm665_vm1, %v1740_v53, 0.0  ;;  %v809_v58 = vsel %vm665_vm1, %v1779_v8, 0.0  ;;  %v1004_v50 = vsel %vm665_vm1, %v902_v36, 0.0  ;;  %v811_v53 = vsel %vm665_vm1, %v1766_v3, 0.0 }
 0x12e   :  { %v991_v60 = vadd.f32 %v990_v52, %v989_v55  ;;  %v796_v63 = vadd.f32 %v795_v59, %v794_v56  ;;  %v904_v52 = vmul.f32 %v1766_v3, %v1766_v3  ;;  %v1006_v54 = vsel %vm665_vm1, %v903_v40, 0.0 }
 0x12f   :  { %v905_v55 = vmul.f32 %v1805_v24, %v1805_v24  ;;  %v813_v8 = vsel %vm665_vm1, %v1805_v24, 0.0  ;;  %v815_v3 = vsel %vm665_vm1, %v1792_v18, 0.0  ;;  %v817_v24 = vsel %vm665_vm1, %v1831_v41, 0.0 }
 0x130   :  { %v798_v9 = vadd.f32 %v797_v20, %v796_v63  ;;  %v993_v11 = vadd.f32 %v992_v0, %v991_v60  ;;  %v1008_v63 = vsel %vm665_vm1, %v904_v52, 0.0  ;;  %v906_v0 = vmul.f32 %v1792_v18, %v1792_v18 }
 0x131   :  { %v1010_v1 = vsel %vm665_vm1, %v905_v55, 0.0  ;;  %v819_v18 = vsel %vm665_vm1, %v1818_v35, 0.0 }
 0x132   :  { %v995_v12 = vadd.f32 %v994_v5, %v993_v11  ;;  %v800_v13 = vadd.f32 %v799_v17, %v798_v9  ;;  %v907_v5 = vmul.f32 %v1831_v41, %v1831_v41  ;;  %v821_v41 = vsel %vm665_vm1, %v1857_v57, 0.0 }
 0x134   :  { %v802_v26 = vadd.f32 %v801_v31, %v800_v13  ;;  %v997_v28 = vadd.f32 %v996_v14, %v995_v12  ;;  %v1012_v31 = vsel %vm665_vm1, %v906_v0, 0.0  ;;  %v908_v12 = vmul.f32 %v1818_v35, %v1818_v35 }
 0x135   :  { %v1014_v13 = vsel %vm665_vm1, %v907_v5, 0.0  ;;  %v909_v14 = vmul.f32 %v1857_v57, %v1857_v57  ;;  %v823_v35 = vsel %vm665_vm1, %v1844_v51, 0.0  ;;  %v825_v57 = vsel %vm665_vm1, %v1883_v10, 0.0 }
 0x136   :  { %v999_v30 = vadd.f32 %v998_v19, %v997_v28  ;;  %v804_v32 = vadd.f32 %v803_v27, %v802_v26  ;;  %v1016_v28 = vsel %vm665_vm1, %v908_v12, 0.0  ;;  %v910_v27 = vmul.f32 %v1844_v51, %v1844_v51 }
 0x137   :  { %v827_v51 = vsel %vm665_vm1, %v1870_v4, 0.0 }
 0x138   :  { %v806_v43 = vadd.f32 %v805_v44, %v804_v32  ;;  %v1001_v45 = vadd.f32 %v1000_v34, %v999_v30  ;;  %v1018_v44 = vsel %vm665_vm1, %v909_v14, 0.0  ;;  %v911_v30 = vmul.f32 %v1883_v10, %v1883_v10 }
 0x139   :  { %v1020_v40 = vsel %vm665_vm1, %v910_v27, 0.0  ;;  %v829_v10 = vsel %vm665_vm1, %v1909_v29, 0.0 }
 0x13a   :  { %v1003_v46 = vadd.f32 %v1002_v37, %v1001_v45  ;;  %v808_v49 = vadd.f32 %v807_v39, %v806_v43  ;;  %v912_v43 = vmul.f32 %v1870_v4, %v1870_v4  ;;  %v1022_v45 = vsel %vm665_vm1, %v911_v30, 0.0 }
 0x13b   :  { %v913_v39 = vmul.f32 %v1909_v29, %v1909_v29  ;;  %v831_v4 = vsel %vm665_vm1, %v1896_v22, 0.0  ;;  %v833_v29 = vsel %vm665_vm1, %v1935_v48, 0.0 }
 0x13c   :  { %v810_v56 = vadd.f32 %v809_v58, %v808_v49  ;;  %v1005_v59 = vadd.f32 %v1004_v50, %v1003_v46  ;;  %v1024_v52 = vsel %vm665_vm1, %v912_v43, 0.0 }
 0x13d   :  { %v1026_v55 = vsel %vm665_vm1, %v913_v39, 0.0 }
 0x13e   :  { %v1007_v20 = vadd.f32 %v1006_v54, %v1005_v59  ;;  %v812_v60 = vadd.f32 %v811_v53, %v810_v56  ;;  %v914_v54 = vmul.f32 %v1896_v22, %v1896_v22  ;;  %v915_v56 = vmul.f32 %v1935_v48, %v1935_v48 }
 0x13f   :  { %v835_v22 = vsel %vm665_vm1, %v1922_v42, 0.0  ;;  %v837_v48 = vsel %vm665_vm1, %v1961_v2, 0.0 }
 0x140   :  { %v814_v7 = vadd.f32 %v813_v8, %v812_v60  ;;  %v1009_v9 = vadd.f32 %v1008_v63, %v1007_v20  ;;  %v1028_v60 = vsel %vm665_vm1, %v914_v54, 0.0  ;;  %v916_v63 = vmul.f32 %v1922_v42, %v1922_v42 }
 0x141   :  { %v1030_v0 = vsel %vm665_vm1, %v915_v56, 0.0  ;;  %v839_v42 = vsel %vm665_vm1, %v1948_v61, 0.0 }
 0x142   :  { %v1011_v11 = vadd.f32 %v1010_v1, %v1009_v9  ;;  %v816_v17 = vadd.f32 %v815_v3, %v814_v7  ;;  %v917_v1 = vmul.f32 %v1961_v2, %v1961_v2  ;;  %v841_v2 = vsel %vm665_vm1, %v1987_v25, 0.0 }
 0x144   :  { %v818_v16 = vadd.f32 %v817_v24, %v816_v17  ;;  %v1013_v19 = vadd.f32 %v1012_v31, %v1011_v11  ;;  %v1032_v24 = vsel %vm665_vm1, %v916_v63, 0.0  ;;  %v918_v11 = vmul.f32 %v1948_v61, %v1948_v61 }
 0x145   :  { %v1034_v17 = vsel %vm665_vm1, %v917_v1, 0.0  ;;  %v919_v31 = vmul.f32 %v1987_v25, %v1987_v25  ;;  %v843_v61 = vsel %vm665_vm1, %v1974_v15, 0.0  ;;  %v845_v25 = vsel %vm665_vm1, %v2013_v47, 0.0 }
 0x146   :  { %v1015_v21 = vadd.f32 %v1014_v13, %v1013_v19  ;;  %v820_v26 = vadd.f32 %v819_v18, %v818_v16  ;;  %v1036_v19 = vsel %vm665_vm1, %v918_v11, 0.0  ;;  %v920_v18 = vmul.f32 %v1974_v15, %v1974_v15 }
 0x147   :  { %v847_v15 = vsel %vm665_vm1, %v2000_v38, 0.0 }
 0x148   :  { %v822_v32 = vadd.f32 %v821_v41, %v820_v26  ;;  %v1017_v34 = vadd.f32 %v1016_v28, %v1015_v21  ;;  %v1038_v41 = vsel %vm665_vm1, %v919_v31, 0.0  ;;  %v921_v21 = vmul.f32 %v2013_v47, %v2013_v47 }
 0x149   :  { %v1040_v30 = vsel %vm665_vm1, %v920_v18, 0.0  ;;  %v849_v47 = vsel %vm665_vm1, %v2039_v6, 0.0 }
 0x14a   :  { %v1019_v36 = vadd.f32 %v1018_v44, %v1017_v34  ;;  %v824_v37 = vadd.f32 %v823_v35, %v822_v32  ;;  %v922_v32 = vmul.f32 %v2000_v38, %v2000_v38  ;;  %v1042_v34 = vsel %vm665_vm1, %v921_v21, 0.0 }
 0x14b   :  { %v923_v35 = vmul.f32 %v2039_v6, %v2039_v6  ;;  %v851_v38 = vsel %vm665_vm1, %v2026_v62, 0.0  ;;  %v853_v6 = vsel %vm665_vm1, %v2067_v33, 0.0 }
 0x14c   :  { %v826_v58 = vadd.f32 %v825_v57, %v824_v37  ;;  %v1021_v46 = vadd.f32 %v1020_v40, %v1019_v36  ;;  %v1044_v43 = vsel %vm665_vm1, %v922_v32, 0.0 }
 0x14d   :  { %v1046_v39 = vsel %vm665_vm1, %v923_v35, 0.0 }
 0x14e   :  { %v1023_v49 = vadd.f32 %v1022_v45, %v1021_v46  ;;  %v828_v50 = vadd.f32 %v827_v51, %v826_v58  ;;  %v924_v45 = vmul.f32 %v2026_v62, %v2026_v62  ;;  %v925_v58 = vmul.f32 %v2067_v33, %v2067_v33 }
 0x150   :  { %v830_v59 = vadd.f32 %v829_v10, %v828_v50  ;;  %v1025_v53 = vadd.f32 %v1024_v52, %v1023_v49  ;;  %v1048_v50 = vsel %vm665_vm1, %v924_v45, 0.0  ;;  %v926_v52 = vmul.f32 %v2054_v23, %v2054_v23 }
 0x151   :  { %v1050_v54 = vsel %vm665_vm1, %v925_v58, 0.0 }
 0x152   :  { %v1027_v8 = vadd.f32 %v1026_v55, %v1025_v53  ;;  %v832_v20 = vadd.f32 %v831_v4, %v830_v59  ;;  %v855_v59 = vsel %vm665_vm1, %v2054_v23, 0.0  ;;  %v1052_v62 = vsel %vm665_vm1, %v926_v52, 0.0 }
 0x154   :  { %v834_v5 = vadd.f32 %v833_v29, %v832_v20  ;;  %v1029_v7 = vadd.f32 %v1028_v60, %v1027_v8 }
 0x156   :  { %v1031_v9 = vadd.f32 %v1030_v0, %v1029_v7  ;;  %v836_v3 = vadd.f32 %v835_v22, %v834_v5 }
 0x158   :  { %v838_v12 = vadd.f32 %v837_v48, %v836_v3  ;;  %v1033_v13 = vadd.f32 %v1032_v24, %v1031_v9 }
 0x15a   :  { %v1035_v14 = vadd.f32 %v1034_v17, %v1033_v13  ;;  %v840_v16 = vadd.f32 %v839_v42, %v838_v12 }
 0x15c   :  { %v842_v26 = vadd.f32 %v841_v2, %v840_v16  ;;  %v1037_v28 = vadd.f32 %v1036_v19, %v1035_v14 }
 0x15e   :  { %v1039_v27 = vadd.f32 %v1038_v41, %v1037_v28  ;;  %v844_v44 = vadd.f32 %v843_v61, %v842_v26 }
 0x160   :  { %v846_v57 = vadd.f32 %v845_v25, %v844_v44  ;;  %v1041_v36 = vadd.f32 %v1040_v30, %v1039_v27 }
 0x162   :  { %v1043_v37 = vadd.f32 %v1042_v34, %v1041_v36  ;;  %v848_v40 = vadd.f32 %v847_v15, %v846_v57 }
 0x164   :  { %v850_v46 = vadd.f32 %v849_v47, %v848_v40  ;;  %v1045_v51 = vadd.f32 %v1044_v43, %v1043_v37 }
 0x166   :  { %v1047_v10 = vadd.f32 %v1046_v39, %v1045_v51  ;;  %v852_v49 = vadd.f32 %v851_v38, %v850_v46 }
 0x168   :  { %v854_v55 = vadd.f32 %v853_v6, %v852_v49  ;;  %v1049_v56 = vadd.f32 %v1048_v50, %v1047_v10 }
 0x16a   :  { %v856_v53 = vadd.f32 %v855_v59, %v854_v55  ;;  %v1051_v4 = vadd.f32 %v1050_v54, %v1049_v56 }
 0x16c   :  { %v857_v29 = vrot.slane %v856_v53, 4  ;;  %v1053_v33 = vadd.f32 %v1052_v62, %v1051_v4 }
 0x16e   :  { %v858_v8 = vadd.f32 %v857_v29, %v856_v53  ;;  %v1054_v20 = vrot.slane %v1053_v33, 4 }
 0x170   :  { %v859_v60 = vrot.slane %v858_v8, 2  ;;  %v1055_v63 = vadd.f32 %v1054_v20, %v1053_v33 }
 0x172   :  { %v860_v0 = vadd.f32 %v859_v60, %v858_v8  ;;  %v1056_v1 = vrot.slane %v1055_v63, 2 }
 0x174   :  { %v861_v5 = vrot.slane %v860_v0, 1  ;;  %v1057_v7 = vadd.f32 %v1056_v1, %v1055_v63 }
 0x176   :  { %v862_v22 = vadd.f32 %v861_v5, %v860_v0  ;;  %v1058_v48 = vrot.slane %v1057_v7, 1 }
 0x178   :  { %v1059_v9 = vadd.f32 %v1058_v48, %v1057_v7  ;;  %1060 = vst.msk [vmem:[%s2246_s3] sm:$0xff] %vm665_vm1, %v862_v22 }
 0x17a   :  { %1061 = vst.msk [vmem:[%s2247_s4] sm:$0xff] %vm665_vm1, %v1059_v9 }

// kernel: residual_block_forward.5
= control target key start
LH: loop header
LB: loop body
LE: loop exit
PB: predicated region body
PF: predicated region fallthrough
CT: control target
= control target key end

     0   :  { %s136_s0 = inlined_call_operand.vmem [shape: f32[32,128], index: 0, kind: input, shape index: {}]   ;;  %s137_s1 = inlined_call_operand.vmem [shape: f32[1,128], index: 1, kind: input, shape index: {}]   ;;  %s138_s2 = inlined_call_operand.vmem [shape: f32[1,128], index: 2, kind: input, shape index: {}]   ;;  %s139_s3 = inlined_call_operand.vmem [shape: f32[32,128], index: 3, kind: input, shape index: {}]   ;;  %s140_s4 = inlined_call_operand.vmem [shape: f32[32,128], index: 4, kind: output, shape index: {}]  }
   0x1   :  { %v17_v0 = vld [vmem:[%s136_s0] sm:$0xff]  ;;  %v18_v4 = vld [vmem:[%s136_s0 + $0x8] sm:$0xff]  ;;  %v19_v6 = vld [vmem:[%s136_s0 + $0x10] sm:$0xff] }
   0x2   :  { %v67_v1 = vld [vmem:[%s137_s1] ss:$0 sm:$0xff]  ;;  %v20_v7 = vld [vmem:[%s136_s0 + $0x18] sm:$0xff]  ;;  %v48_v14 = vld [vmem:[%s139_s3 + $0x8] sm:$0xff] }
   0x3   :  { %v68_v2 = vld [vmem:[%s138_s2] ss:$0 sm:$0xff]  ;;  %v28_v3 = vmul.f32 %v67_v1, %v17_v0  ;;  %v29_v5 = vmul.f32 %v67_v1, %v18_v4  ;;  %v30_v9 = vmul.f32 %v67_v1, %v19_v6  ;;  %v31_v10 = vmul.f32 %v67_v1, %v20_v7  ;;  %v49_v18 = vld [vmem:[%s139_s3 + $0x10] sm:$0xff]  ;;  %v50_v19 = vld [vmem:[%s139_s3 + $0x18] sm:$0xff] }
   0x4   :  { %v47_v11 = vld [vmem:[%s139_s3] sm:$0xff] }
   0x5   :  { %v39_v8 = vadd.f32 %v68_v2, %v28_v3  ;;  %v40_v12 = vadd.f32 %v68_v2, %v29_v5  ;;  %v41_v15 = vadd.f32 %v68_v2, %v30_v9  ;;  %v42_v16 = vadd.f32 %v68_v2, %v31_v10 }
   0x7   :  { %v43_v13 = vmax.f32 %v39_v8, 0.0  ;;  %v44_v17 = vmax.f32 %v40_v12, 0.0  ;;  %v45_v21 = vmax.f32 %v41_v15, 0.0  ;;  %v46_v22 = vmax.f32 %v42_v16, 0.0 }
   0x9   :  { %v51_v20 = vadd.f32 %v47_v11, %v43_v13  ;;  %v52_v23 = vadd.f32 %v48_v14, %v44_v17  ;;  %v53_v25 = vadd.f32 %v49_v18, %v45_v21  ;;  %v54_v26 = vadd.f32 %v50_v19, %v46_v22 }
   0xb   :  { %v55_v24 = vmax.f32 %v51_v20, 0.0  ;;  %v56_v27 = vmax.f32 %v52_v23, 0.0  ;;  %v57_v28 = vmax.f32 %v53_v25, 0.0  ;;  %v58_v29 = vmax.f32 %v54_v26, 0.0 }
   0xd   :  { %59 = vst [vmem:[%s140_s4] sm:$0xff] %v55_v24  ;;  %60 = vst [vmem:[%s140_s4 + $0x8] sm:$0xff] %v56_v27 }
   0xe   :  { %61 = vst [vmem:[%s140_s4 + $0x10] sm:$0xff] %v57_v28  ;;  %62 = vst [vmem:[%s140_s4 + $0x18] sm:$0xff] %v58_v29 }

</bundles_post_ra>
